<compile_context>
chip_gen: v5e
topology: v5e:2x2
jax: 0.10.0
libtpu: 0.0.40
codegen_flags: <defaults>
</compile_context>

<pallas_src>
import functools

import jax
import jax.numpy as jnp
from jax.experimental import pallas as pl
from jax.experimental.pallas import tpu as pltpu

_LANE = 128       # lane width (last dim); see TODO above re 256 on v6e/v7x
_SUBLANE = 8      # sublane count (second-to-last dim)
_MAX_TM = 256     # max batch rows per grid step / MXU pass
_MIB = 1024 * 1024


def _round_up(n, m):
    return ((n + m - 1) // m) * m


def _mlp_fused_kernel(x_ref, *refs):
    """refs = (w0, b0, w1, b1, ..., wL, bL, out).  One batch tile per call."""
    *param_refs, o_ref = refs
    n_layers = len(param_refs) // 2

    h = x_ref[...]                                   # f32 (tm, K0)
    for i in range(n_layers):
        w = param_refs[2 * i][...]                   # bf16 (K, N)
        b = param_refs[2 * i + 1][...]               # f32  (1, N)
        acc = jnp.dot(h.astype(jnp.bfloat16), w,
                      preferred_element_type=jnp.float32)
        h = acc + b                                  # bias add / ReLU in f32
        if i < n_layers - 1:                         # no ReLU on output layer
            h = jnp.maximum(h, 0.0)
    o_ref[...] = h.astype(o_ref.dtype)


def mlp_fused_pallas(x_pad, flat_params, tm):
    mp, k0 = x_pad.shape
    n_out = flat_params[-2].shape[1]                 # padded output features
    grid = (mp // tm,)

    # x / out tiles move with the batch grid axis; params use a constant block
    # index (stay VMEM-resident across grid steps).
    in_specs = [pl.BlockSpec((tm, k0), lambda m: (m, 0))]
    for p in flat_params:
        in_specs.append(pl.BlockSpec(p.shape, lambda m: (0, 0)))
    out_spec = pl.BlockSpec((tm, n_out), lambda m: (m, 0))

    # Advisory cost estimate for XLA scheduling.
    flops = 0
    bytes_accessed = x_pad.size * x_pad.dtype.itemsize + mp * n_out * 4
    for i in range(0, len(flat_params), 2):
        w, b = flat_params[i], flat_params[i + 1]
        flops += 2 * mp * w.shape[0] * w.shape[1]
        bytes_accessed += w.size * w.dtype.itemsize + b.size * b.dtype.itemsize

    # VMEM budget: resident params + double-buffered x/out tiles + a few
    # activation-sized intermediates, with 2x headroom.  Kept <= 48 MiB so it
    # fits v7x's 64 MiB physical VMEM with room for compiler scratch.
    param_bytes = sum(p.size * p.dtype.itemsize for p in flat_params)
    max_n = max(flat_params[i].shape[1] for i in range(0, len(flat_params), 2))
    tile_bytes = 2 * (tm * k0 * 4 + tm * n_out * 4) + 4 * tm * max_n * 4
    vmem_limit = int(min(48 * _MIB, max(32 * _MIB, 2 * (param_bytes + tile_bytes))))

    return pl.pallas_call(
        _mlp_fused_kernel,
        out_shape=jax.ShapeDtypeStruct((mp, n_out), jnp.float32),
        grid=grid,
        in_specs=in_specs,
        out_specs=out_spec,
        compiler_params=pltpu.CompilerParams(
            dimension_semantics=("parallel",),      # v7x: both TCs split batch
            vmem_limit_bytes=vmem_limit),
        cost_estimate=pl.CostEstimate(
            flops=int(flops), transcendentals=0,
            bytes_accessed=int(bytes_accessed)),
    )(x_pad, *flat_params)


def init_mlp_params(key, input_size, hidden_size, output_size, num_hidden_layers):
    """nn.Linear-style init (uniform +-1/sqrt(fan_in)); weights stored (in, out)."""
    sizes = ([(input_size, hidden_size)]
             + [(hidden_size, hidden_size)] * (num_hidden_layers - 1)
             + [(hidden_size, output_size)])
    params = []
    for fan_in, fan_out in sizes:
        key, kw, kb = jax.random.split(key, 3)
        bound = 1.0 / float(fan_in) ** 0.5
        w = jax.random.uniform(kw, (fan_in, fan_out), jnp.float32, -bound, bound)
        b = jax.random.uniform(kb, (1, fan_out), jnp.float32, -bound, bound)
        params.append((w, b))
    # pos = arange(0, input_size) * 100, shape (1, input_size)
    pos = (jnp.arange(0, input_size, dtype=jnp.float32) * 100.0)[None, :]
    return params, pos


def prepare_fused_params(params, pos):
    """Fold pos into the first bias (in f32), pad feature dims to 128 lanes,
    cast weights to bf16.  Biases stay f32 (added after f32 accumulation)."""
    (w0, b0) = params[0]
    # (x + pos) @ W0 + b0 == x @ W0 + (b0 + pos @ W0); fold done in f32.
    b0_eff = b0 + pos @ w0
    layers = [(w0, b0_eff)] + list(params[1:])

    flat = []
    for idx, (w, b) in enumerate(layers):
        k, n = w.shape
        # First layer keeps its true K (so x needs no feature-dim pad copy);
        # hidden/output K dims were already padded as the previous layer's N.
        kp = k if idx == 0 else _round_up(k, _LANE)
        np_ = _round_up(n, _LANE)
        # Zero padding is exact: padded activation lanes get zero bias and hit
        # zero weight rows downstream.
        w_pad = jnp.zeros((kp, np_), jnp.float32).at[:k, :n].set(w)
        b_pad = jnp.zeros((1, np_), jnp.float32).at[:, :n].set(b)
        flat += [w_pad.astype(jnp.bfloat16), b_pad]
    return flat


@functools.partial(jax.jit, static_argnames=("output_size",))
def mlp_forward(x, flat_params, output_size):
    batch, k0 = x.shape
    tm = min(_round_up(batch, _SUBLANE), _MAX_TM)
    mp = _round_up(batch, tm)
    if mp != batch:
        # Only the batch (row) dim is padded; padded rows are garbage downstream
        # but are sliced off below — keep that invariant.
        x_in = jnp.zeros((mp, k0), x.dtype).at[:batch].set(x)
    else:
        x_in = x
    out_pad = mlp_fused_pallas(x_in, flat_params, tm)
    return out_pad[:batch, :output_size]


if __name__ == "__main__":
    input_size = 16
    hidden_size = 32
    output_size = 8
    num_hidden_layers = 3
    batch = 4

    key = jax.random.PRNGKey(0)
    key, kx = jax.random.split(key)
    x = jax.random.normal(kx, (batch, input_size), jnp.float32)

    params, pos = init_mlp_params(key, input_size, hidden_size,
                                  output_size, num_hidden_layers)
    flat_params = prepare_fused_params(params, pos)

    out = jax.block_until_ready(mlp_forward(x, flat_params, output_size))

    # Reference in plain f32 JAX following the original module semantics exactly.
    ref = x + pos
    ref = jnp.maximum(ref @ params[0][0] + params[0][1], 0.0)
    for (w, b) in params[1:-1]:
        ref = jnp.maximum(ref @ w + b, 0.0)
    ref = ref @ params[-1][0] + params[-1][1]

    assert out.shape == (batch, output_size)
    # Kernel uses bf16 matmul operands (f32 accumulate) vs the f32 reference;
    # activations reach ~(input_size-1)*100 via pos, so compare on the overall
    # magnitude scale rather than per-element rtol.
    scale = float(jnp.max(jnp.abs(ref))) + 1e-6
    err = float(jnp.max(jnp.abs(out - ref)))
    assert err <= 5e-2 * scale, (err, scale)

    print("KERNEL_OK")
</pallas_src>

<mosaic_0001>
module attributes {stable_mosaic.version = 11 : i64} {
  func.func @_mlp_fused_kernel(%arg0: i32, %arg1: memref<8x16xf32, #tpu.memory_space<vmem>>, %arg2: memref<16x128xbf16, #tpu.memory_space<vmem>>, %arg3: memref<1x128xf32, #tpu.memory_space<vmem>>, %arg4: memref<128x128xbf16, #tpu.memory_space<vmem>>, %arg5: memref<1x128xf32, #tpu.memory_space<vmem>>, %arg6: memref<128x128xbf16, #tpu.memory_space<vmem>>, %arg7: memref<1x128xf32, #tpu.memory_space<vmem>>, %arg8: memref<128x128xbf16, #tpu.memory_space<vmem>>, %arg9: memref<1x128xf32, #tpu.memory_space<vmem>>, %arg10: memref<8x128xf32, #tpu.memory_space<vmem>>) attributes {dimension_semantics = [#tpu.dimension_semantics<parallel>], iteration_bounds = array<i64: 1>, scalar_prefetch = 0 : i64, scratch_operands = 0 : i64, tpu.core_type = #tpu.core_type<tc>, window_params = [{transform_indices = @transform_0, window_bounds = array<i64: 8, 16>}, {pipeline_mode = #tpu.pipeline_mode<synchronous>, transform_indices = @transform_1, window_bounds = array<i64: 16, 128>}, {pipeline_mode = #tpu.pipeline_mode<synchronous>, transform_indices = @transform_2, window_bounds = array<i64: 1, 128>}, {pipeline_mode = #tpu.pipeline_mode<synchronous>, transform_indices = @transform_3, window_bounds = array<i64: 128, 128>}, {pipeline_mode = #tpu.pipeline_mode<synchronous>, transform_indices = @transform_4, window_bounds = array<i64: 1, 128>}, {pipeline_mode = #tpu.pipeline_mode<synchronous>, transform_indices = @transform_5, window_bounds = array<i64: 128, 128>}, {pipeline_mode = #tpu.pipeline_mode<synchronous>, transform_indices = @transform_6, window_bounds = array<i64: 1, 128>}, {pipeline_mode = #tpu.pipeline_mode<synchronous>, transform_indices = @transform_7, window_bounds = array<i64: 128, 128>}, {pipeline_mode = #tpu.pipeline_mode<synchronous>, transform_indices = @transform_8, window_bounds = array<i64: 1, 128>}, {transform_indices = @transform_9, window_bounds = array<i64: 8, 128>}]} {
    %c0 = arith.constant 0 : index
    %c0_0 = arith.constant 0 : index
    %0 = vector.load %arg1[%c0, %c0_0] : memref<8x16xf32, #tpu.memory_space<vmem>>, vector<8x16xf32>
    %c0_1 = arith.constant 0 : index
    %c0_2 = arith.constant 0 : index
    %1 = vector.load %arg2[%c0_1, %c0_2] : memref<16x128xbf16, #tpu.memory_space<vmem>>, vector<16x128xbf16>
    %c0_3 = arith.constant 0 : index
    %c0_4 = arith.constant 0 : index
    %2 = vector.load %arg3[%c0_3, %c0_4] : memref<1x128xf32, #tpu.memory_space<vmem>>, vector<1x128xf32>
    %3 = arith.truncf %0 : vector<8x16xf32> to vector<8x16xbf16>
    %cst = arith.constant dense<0.000000e+00> : vector<8x128xf32>
    %4 = tpu.matmul %3, %1, %cst {dimension_numbers = #tpu.dot_dimension_numbers<[1], [0], [0], [1], [0, 0, 1, 1], [], []>} : vector<8x16xbf16>, vector<16x128xbf16>, vector<8x128xf32> -> vector<8x128xf32>
    %5 = vector.broadcast %2 : vector<1x128xf32> to vector<8x128xf32>
    %6 = arith.addf %4, %5 : vector<8x128xf32>
    %cst_5 = arith.constant 0.000000e+00 : f32
    %7 = vector.broadcast %cst_5 : f32 to vector<8x128xf32>
    %8 = arith.maximumf %6, %7 : vector<8x128xf32>
    %c0_6 = arith.constant 0 : index
    %c0_7 = arith.constant 0 : index
    %9 = vector.load %arg4[%c0_6, %c0_7] : memref<128x128xbf16, #tpu.memory_space<vmem>>, vector<128x128xbf16>
    %c0_8 = arith.constant 0 : index
    %c0_9 = arith.constant 0 : index
    %10 = vector.load %arg5[%c0_8, %c0_9] : memref<1x128xf32, #tpu.memory_space<vmem>>, vector<1x128xf32>
    %11 = arith.truncf %8 : vector<8x128xf32> to vector<8x128xbf16>
    %cst_10 = arith.constant dense<0.000000e+00> : vector<8x128xf32>
    %12 = tpu.matmul %11, %9, %cst_10 {dimension_numbers = #tpu.dot_dimension_numbers<[1], [0], [0], [1], [0, 0, 1, 1], [], []>} : vector<8x128xbf16>, vector<128x128xbf16>, vector<8x128xf32> -> vector<8x128xf32>
    %13 = vector.broadcast %10 : vector<1x128xf32> to vector<8x128xf32>
    %14 = arith.addf %12, %13 : vector<8x128xf32>
    %cst_11 = arith.constant 0.000000e+00 : f32
    %15 = vector.broadcast %cst_11 : f32 to vector<8x128xf32>
    %16 = arith.maximumf %14, %15 : vector<8x128xf32>
    %c0_12 = arith.constant 0 : index
    %c0_13 = arith.constant 0 : index
    %17 = vector.load %arg6[%c0_12, %c0_13] : memref<128x128xbf16, #tpu.memory_space<vmem>>, vector<128x128xbf16>
    %c0_14 = arith.constant 0 : index
    %c0_15 = arith.constant 0 : index
    %18 = vector.load %arg7[%c0_14, %c0_15] : memref<1x128xf32, #tpu.memory_space<vmem>>, vector<1x128xf32>
    %19 = arith.truncf %16 : vector<8x128xf32> to vector<8x128xbf16>
    %cst_16 = arith.constant dense<0.000000e+00> : vector<8x128xf32>
    %20 = tpu.matmul %19, %17, %cst_16 {dimension_numbers = #tpu.dot_dimension_numbers<[1], [0], [0], [1], [0, 0, 1, 1], [], []>} : vector<8x128xbf16>, vector<128x128xbf16>, vector<8x128xf32> -> vector<8x128xf32>
    %21 = vector.broadcast %18 : vector<1x128xf32> to vector<8x128xf32>
    %22 = arith.addf %20, %21 : vector<8x128xf32>
    %cst_17 = arith.constant 0.000000e+00 : f32
    %23 = vector.broadcast %cst_17 : f32 to vector<8x128xf32>
    %24 = arith.maximumf %22, %23 : vector<8x128xf32>
    %c0_18 = arith.constant 0 : index
    %c0_19 = arith.constant 0 : index
    %25 = vector.load %arg8[%c0_18, %c0_19] : memref<128x128xbf16, #tpu.memory_space<vmem>>, vector<128x128xbf16>
    %c0_20 = arith.constant 0 : index
    %c0_21 = arith.constant 0 : index
    %26 = vector.load %arg9[%c0_20, %c0_21] : memref<1x128xf32, #tpu.memory_space<vmem>>, vector<1x128xf32>
    %27 = arith.truncf %24 : vector<8x128xf32> to vector<8x128xbf16>
    %cst_22 = arith.constant dense<0.000000e+00> : vector<8x128xf32>
    %28 = tpu.matmul %27, %25, %cst_22 {dimension_numbers = #tpu.dot_dimension_numbers<[1], [0], [0], [1], [0, 0, 1, 1], [], []>} : vector<8x128xbf16>, vector<128x128xbf16>, vector<8x128xf32> -> vector<8x128xf32>
    %29 = vector.broadcast %26 : vector<1x128xf32> to vector<8x128xf32>
    %30 = arith.addf %28, %29 : vector<8x128xf32>
    %c0_23 = arith.constant 0 : index
    %c0_24 = arith.constant 0 : index
    %31 = vector.load %arg10[%c0_23, %c0_24] : memref<8x128xf32, #tpu.memory_space<vmem>>, vector<8x128xf32>
    tpu.vector_store %arg10[%c0_23, %c0_24], %30 {strides = array<i32>} : memref<8x128xf32, #tpu.memory_space<vmem>>, vector<8x128xf32>,
    return
  }
  func.func @transform_0(%arg0: i32) -> (i32, i32) {
    %c0_i32 = arith.constant 0 : i32
    %c0_i32_0 = arith.constant 0 : i32
    return %arg0, %c0_i32 : i32, i32
  }
  func.func @transform_1(%arg0: i32) -> (i32, i32) {
    %c0_i32 = arith.constant 0 : i32
    %c0_i32_0 = arith.constant 0 : i32
    %c0_i32_1 = arith.constant 0 : i32
    return %c0_i32, %c0_i32_0 : i32, i32
  }
  func.func @transform_2(%arg0: i32) -> (i32, i32) {
    %c0_i32 = arith.constant 0 : i32
    %c0_i32_0 = arith.constant 0 : i32
    %c0_i32_1 = arith.constant 0 : i32
    return %c0_i32, %c0_i32_0 : i32, i32
  }
  func.func @transform_3(%arg0: i32) -> (i32, i32) {
    %c0_i32 = arith.constant 0 : i32
    %c0_i32_0 = arith.constant 0 : i32
    %c0_i32_1 = arith.constant 0 : i32
    return %c0_i32, %c0_i32_0 : i32, i32
  }
  func.func @transform_4(%arg0: i32) -> (i32, i32) {
    %c0_i32 = arith.constant 0 : i32
    %c0_i32_0 = arith.constant 0 : i32
    %c0_i32_1 = arith.constant 0 : i32
    return %c0_i32, %c0_i32_0 : i32, i32
  }
  func.func @transform_5(%arg0: i32) -> (i32, i32) {
    %c0_i32 = arith.constant 0 : i32
    %c0_i32_0 = arith.constant 0 : i32
    %c0_i32_1 = arith.constant 0 : i32
    return %c0_i32, %c0_i32_0 : i32, i32
  }
  func.func @transform_6(%arg0: i32) -> (i32, i32) {
    %c0_i32 = arith.constant 0 : i32
    %c0_i32_0 = arith.constant 0 : i32
    %c0_i32_1 = arith.constant 0 : i32
    return %c0_i32, %c0_i32_0 : i32, i32
  }
  func.func @transform_7(%arg0: i32) -> (i32, i32) {
    %c0_i32 = arith.constant 0 : i32
    %c0_i32_0 = arith.constant 0 : i32
    %c0_i32_1 = arith.constant 0 : i32
    return %c0_i32, %c0_i32_0 : i32, i32
  }
  func.func @transform_8(%arg0: i32) -> (i32, i32) {
    %c0_i32 = arith.constant 0 : i32
    %c0_i32_0 = arith.constant 0 : i32
    %c0_i32_1 = arith.constant 0 : i32
    return %c0_i32, %c0_i32_0 : i32, i32
  }
  func.func @transform_9(%arg0: i32) -> (i32, i32) {
    %c0_i32 = arith.constant 0 : i32
    %c0_i32_0 = arith.constant 0 : i32
    return %arg0, %c0_i32 : i32, i32
  }
}

</mosaic_0001>

<bundles_post_ra>
// kernel: mlp_forward.1
= control target key start
LH: loop header
LB: loop body
LE: loop exit
PB: predicated region body
PF: predicated region fallthrough
CT: control target
= control target key end

     0   :  { %14 = vsyncpa [#allocation3], 0  ;;  %s663_s0 = inlined_call_operand.vmem [shape: f32[8,16], index: 0, kind: input, shape index: {}]   ;;  %s664_s1 = inlined_call_operand.vmem [shape: bf16[16,128], index: 1, kind: input, shape index: {}]   ;;  %s665_s2 = inlined_call_operand.vmem [shape: f32[1,128], index: 2, kind: input, shape index: {}]   ;;  %s666_s3 = inlined_call_operand.hbm [shape: bf16[128,128], index: 3, kind: input, shape index: {}]   ;;  %s667_s4 = inlined_call_operand.vmem [shape: f32[1,128], index: 4, kind: input, shape index: {}]   ;;  %s668_s5 = inlined_call_operand.hbm [shape: bf16[128,128], index: 5, kind: input, shape index: {}]   ;;  %s669_s6 = inlined_call_operand.vmem [shape: f32[1,128], index: 6, kind: input, shape index: {}]   ;;  %s670_s7 = inlined_call_operand.hbm [shape: bf16[128,128], index: 7, kind: input, shape index: {}]   ;;  %s671_s8 = inlined_call_operand.vmem [shape: f32[1,128], index: 8, kind: input, shape index: {}]   ;;  %s672_s9 = inlined_call_operand.vmem [shape: f32[8,128], index: 9, kind: output, shape index: {}]  }
   0x1   :  { %15 = vsyncpa [#allocation5], 0  ;;  %s41_s11 = sshll.u32 %s668_s5, 4  ;;  %s578_s12 = smov [#allocation4]   ;;  %s42_s11 = int_to_ptr.hbm [resolvable:$true] %s41_s11 }
   0x2   :  { %s43_s13 = sshll.u32 %s578_s12, 4  ;;  %s26_s16 = sshll.u32 %s666_s3, 4  ;;  %s44_s13 = int_to_ptr.vmem [resolvable:$true] %s43_s13  ;;  %s27_s16 = int_to_ptr.hbm [resolvable:$true] %s26_s16 }
   0x3   :  { %s579_s17 = smov 64   ;;  %s580_s18 = smov 4  }
   0x4   :  { %49 = dma.hbm_to_vmem [thread:$0]  %s42_s11, 1024, %s44_s13, [#allocation5], %s579_s17, %s579_s17, %s580_s18  }
   0x5   :  { %s581_s19 = smov [#allocation2]   ;;  %s56_s23 = sshll.u32 %s670_s7, 4  ;;  %s57_s23 = int_to_ptr.hbm [resolvable:$true] %s56_s23 }
   0x6   :  { %s28_s20 = sshll.u32 %s581_s19, 4  ;;  %s582_s5 = smov [#allocation6]   ;;  %s29_s20 = int_to_ptr.vmem [resolvable:$true] %s28_s20 }
   0x7   :  { %34 = dma.hbm_to_vmem [thread:$0]  %s27_s16, 1024, %s29_s20, [#allocation3], %s579_s17, %s579_s17, %s580_s18  }
   0x8   :  { %s58_s24 = sshll.u32 %s582_s5, 4  ;;  %s59_s24 = int_to_ptr.vmem [resolvable:$true] %s58_s24 }
   0x9   :  { %64 = dma.hbm_to_vmem [thread:$0]  %s57_s23, 1024, %s59_s24, [#allocation5], %s579_s17, %s579_s17, %s580_s18  }
   0xa   :  { %574 = dma.done.wait [#allocation3], 1024  }
   0xb   :  { %575 = vsyncadd [#allocation3], 4294966272 }
   0xc   :  { %576 = dma.done.wait [#allocation5], 2048  }
   0xd   :  { %577 = vsyncadd [#allocation5], 4294965248  ;;  %v468_v0 = vld [vmem:[%s664_s1] sm:$0xff]  ;;  %v476_v2 = vld [vmem:[#allocation2 + $0x38] sm:$0xff]  ;;  %vm94_vm0 = vcmask 130048  }
   0xe   :  { %v80_v1 = vld [vmem:[%s663_s0] sm:$0xff]  ;;  %105 = vmatpush.bf16.msra.mxu0 %v468_v0  ;;  %181 = vmatpush.bf16.msra.mxu1 %v476_v2  ;;  %v475_v4 = vld [vmem:[#allocation2 + $0x30] sm:$0xff]  ;;  %v474_v5 = vld [vmem:[#allocation2 + $0x28] sm:$0xff] }
   0xf   :  { %v84_v3 = vpack.c.bf16 %v80_v1, %v80_v1  ;;  %v473_v6 = vld [vmem:[#allocation2 + $0x20] sm:$0xff]  ;;  %v472_v7 = vld [vmem:[#allocation2 + $0x18] sm:$0xff]  ;;  %v471_v8 = vld [vmem:[#allocation2 + $0x10] sm:$0xff] }
  0x10   :  { %v470_v9 = vld [vmem:[#allocation2 + $0x8] sm:$0xff]  ;;  %v469_v10 = vld [vmem:[#allocation2] sm:$0xff]  ;;  %v484_v11 = vld [vmem:[#allocation4 + $0x38] sm:$0xff] }
  0x11   :  { %371 = vmatmul.msk.bf16.vlgmr.msra.gmra.mxu0 %vm94_vm0, %v84_v3  ;;  %264 = vmatpush.bf16.msra.mxu2 %v484_v11  ;;  %v483_v12 = vld [vmem:[#allocation4 + $0x30] sm:$0xff]  ;;  %v482_v13 = vld [vmem:[#allocation4 + $0x28] sm:$0xff]  ;;  %v481_v14 = vld [vmem:[#allocation4 + $0x20] sm:$0xff] }
  0x12   :  { %182 = vmatpush.bf16.msra.mxu1 %v475_v4  ;;  %v480_v15 = vld [vmem:[#allocation4 + $0x18] sm:$0xff]  ;;  %v479_v16 = vld [vmem:[#allocation4 + $0x10] sm:$0xff]  ;;  %v498_v17 = vld [vmem:[%s665_s2] ss:$0 sm:$0xff] }
  0x13   :  { %v478_v23 = vld [vmem:[#allocation4 + $0x8] sm:$0xff]  ;;  %v477_v24 = vld [vmem:[#allocation4] sm:$0xff]  ;;  %v492_v25 = vld [vmem:[#allocation6 + $0x38] sm:$0xff] }
  0x14   :  { %347 = vmatpush.bf16.msra.mxu3 %v492_v25  ;;  %v491_v26 = vld [vmem:[#allocation6 + $0x30] sm:$0xff]  ;;  %v490_v27 = vld [vmem:[#allocation6 + $0x28] sm:$0xff]  ;;  %v489_v28 = vld [vmem:[#allocation6 + $0x20] sm:$0xff] }
  0x15   :  { %265 = vmatpush.bf16.msra.mxu2 %v483_v12  ;;  %v488_v29 = vld [vmem:[#allocation6 + $0x18] sm:$0xff]  ;;  %v487_v30 = vld [vmem:[#allocation6 + $0x10] sm:$0xff]  ;;  %v499_v31 = vld [vmem:[%s667_s4] ss:$0 sm:$0xff] }
  0x16   :  { %183 = vmatpush.bf16.msra.mxu1 %v474_v5  ;;  %v486_v37 = vld [vmem:[#allocation6 + $0x8] sm:$0xff]  ;;  %v485_v38 = vld [vmem:[#allocation6] sm:$0xff] }
  0x17   :  { %v500_v39 = vld [vmem:[%s669_s6] ss:$0 sm:$0xff] }
  0x18   :  { %348 = vmatpush.bf16.msra.mxu3 %v491_v26  ;;  %v501_v45 = vld [vmem:[%s671_s8] ss:$0 sm:$0xff] }
  0x19   :  { %266 = vmatpush.bf16.msra.mxu2 %v482_v13 }
  0x1a   :  { %184 = vmatpush.bf16.msra.mxu1 %v473_v6 }
  0x1c   :  { %349 = vmatpush.bf16.msra.mxu3 %v490_v27 }
  0x1d   :  { %267 = vmatpush.bf16.msra.mxu2 %v481_v14 }
  0x1e   :  { %185 = vmatpush.bf16.msra.mxu1 %v472_v7 }
  0x20   :  { %350 = vmatpush.bf16.msra.mxu3 %v489_v28 }
  0x21   :  { %268 = vmatpush.bf16.msra.mxu2 %v480_v15 }
  0x22   :  { %186 = vmatpush.bf16.msra.mxu1 %v471_v8 }
  0x24   :  { %351 = vmatpush.bf16.msra.mxu3 %v488_v29 }
  0x25   :  { %269 = vmatpush.bf16.msra.mxu2 %v479_v16 }
  0x26   :  { %187 = vmatpush.bf16.msra.mxu1 %v470_v9 }
  0x28   :  { %352 = vmatpush.bf16.msra.mxu3 %v487_v30 }
  0x29   :  { %270 = vmatpush.bf16.msra.mxu2 %v478_v23 }
  0x2a   :  { %188 = vmatpush.bf16.msra.mxu1 %v469_v10 }
  0x2c   :  { %353 = vmatpush.bf16.msra.mxu3 %v486_v37 }
  0x2d   :  { %271 = vmatpush.bf16.msra.mxu2 %v477_v24 }
  0x30   :  { %354 = vmatpush.bf16.msra.mxu3 %v485_v38 }
  0x8e   :  { %v107_v18 = vpop.f32.mrf.mxu0 }
  0x8f   :  { %v108_v19 = vadd.f32 %v498_v17, %v107_v18 }
  0x91   :  { %v111_v20 = vmax.f32 %v108_v19, 0.0 }
  0x93   :  { %v129_v21 = vpack.c.bf16 %v111_v20, %v111_v20 }
  0x95   :  { %189 = vmatmul.bf16.vlgmr.msra.gmra.mxu1 %v129_v21 }
  0x96   :  { %v109_v22 = vpop.f32.mrf.mxu0 }
 0x112   :  { %v190_v32 = vpop.f32.mrf.mxu1 }
 0x113   :  { %v191_v33 = vadd.f32 %v499_v31, %v190_v32 }
 0x115   :  { %v194_v34 = vmax.f32 %v191_v33, 0.0 }
 0x117   :  { %v212_v35 = vpack.c.bf16 %v194_v34, %v194_v34 }
 0x119   :  { %272 = vmatmul.bf16.vlgmr.msra.gmra.mxu2 %v212_v35 }
 0x11a   :  { %v192_v36 = vpop.f32.mrf.mxu1 }
 0x19c   :  { %v273_v40 = vpop.f32.mrf.mxu2 }
 0x19d   :  { %v274_v41 = vadd.f32 %v500_v39, %v273_v40 }
 0x19f   :  { %v277_v42 = vmax.f32 %v274_v41, 0.0 }
 0x1a1   :  { %v295_v43 = vpack.c.bf16 %v277_v42, %v277_v42 }
 0x1a3   :  { %355 = vmatmul.bf16.vlgmr.msra.gmra.mxu3 %v295_v43 }
 0x1a4   :  { %v275_v44 = vpop.f32.mrf.mxu2 }
 0x226   :  { %v356_v46 = vpop.f32.mrf.mxu3 }
 0x227   :  { %v357_v47 = vadd.f32 %v501_v45, %v356_v46 }
 0x229   :  { %360 = vst [vmem:[%s672_s9] sm:$0xff] %v357_v47 }
 0x22e   :  { %v358_v48 = vpop.f32.mrf.mxu3 }
 0x22f   :  { %365 = vsyncpa [#allocation3], 1 }
 0x230   :  { %366 = vsyncpa [#allocation5], 1 }

</bundles_post_ra>
